<compile_context>
chip_gen: v7x
topology: tpu7x:2x2x1
jax: 0.10.0
libtpu: 0.0.40
codegen_flags: <defaults>
</compile_context>

<pallas_src>
import math
import jax
import jax.numpy as jnp
from jax import lax
from jax.experimental import pallas as pl
from jax.experimental.pallas import tpu as pltpu


_INV_SQRT2 = 1.0 / math.sqrt(2.0)


def _gelu_exact(x):
    # torch.nn.GELU() default is the exact (erf) formulation; keep it in f32.
    return 0.5 * x * (1.0 + lax.erf(x * _INV_SQRT2))


def _vision_head_kernel(x_ref, w1_ref, b1_ref, w2_ref, b2_ref, o_ref, h_ref):
    # grid = (M tiles [parallel], V tiles [arbitrary, inner]).
    j = pl.program_id(1)

    # Linear1 + bias + GELU only once per row tile; result lives in VMEM
    # scratch (compute dtype) and is reused for every V tile of this row.
    @pl.when(j == 0)
    def _():
        h = lax.dot_general(
            x_ref[...], w1_ref[...],
            dimension_numbers=(((1,), (1,)), ((), ())),     # (TM,K)·(E,K) -> (TM,E)
            preferred_element_type=jnp.float32)
        h = h + b1_ref[...].astype(jnp.float32)
        h_ref[...] = _gelu_exact(h).astype(h_ref.dtype)

    # Linear2 on the streamed (TN, E) weight tile (PyTorch (out,in) layout).
    y = lax.dot_general(
        h_ref[...], w2_ref[...],
        dimension_numbers=(((1,), (1,)), ((), ())),         # (TM,E)·(TN,E) -> (TM,TN)
        preferred_element_type=jnp.float32)
    y = y + b2_ref[...].astype(jnp.float32)
    o_ref[...] = y.astype(o_ref.dtype)


def _pick_tile(dim, target, align):
    """Largest multiple of `align` that divides `dim` and is <= target,
    falling back to the full dimension (always legal as a block)."""
    if dim <= target:
        return dim
    t = (target // align) * align
    while t >= align:
        if dim % t == 0:
            return t
        t -= align
    return dim


def vision_head_forward(x, w1, b1, w2, b2, *,
                        compute_dtype=jnp.bfloat16,
                        tm_target=256, tn_target=512):
    """
    x  : (B, S, n_embed)
    w1 : (image_token_embed, n_embed)      (PyTorch Linear weight layout)
    b1 : (image_token_embed,)
    w2 : (image_token_size, image_token_embed)
    b2 : (image_token_size,)
    returns (B, S, image_token_size)
    """
    B, S, K = x.shape
    E, K2 = w1.shape
    V, E2 = w2.shape
    assert K == K2 and E == E2, "weight shapes inconsistent with input"
    M = B * S

    TM = _pick_tile(M, tm_target, 8)
    TN = _pick_tile(V, tn_target, 128)
    grid = (M // TM, V // TN)

    out_dtype = x.dtype
    x2d = x.reshape(M, K).astype(compute_dtype)
    w1c = w1.astype(compute_dtype)            # (E, K) — no transpose
    w2c = w2.astype(compute_dtype)            # (V, E) — no transpose
    b1_2d = b1.reshape(1, E).astype(jnp.float32)
    b2_2d = b2.reshape(1, V).astype(jnp.float32)

    itemsize = jnp.dtype(compute_dtype).itemsize
    cost = pl.CostEstimate(
        flops=2 * M * (K * E + E * V),
        transcendentals=M * E,
        bytes_accessed=(M * K * itemsize + E * K * itemsize + V * E * itemsize
                        + (E + V) * 4 + M * V * jnp.dtype(out_dtype).itemsize))

    out = pl.pallas_call(
        _vision_head_kernel,
        out_shape=jax.ShapeDtypeStruct((M, V), out_dtype),
        grid_spec=pltpu.PrefetchScalarGridSpec(
            num_scalar_prefetch=0,
            grid=grid,
            in_specs=[
                pl.BlockSpec((TM, K), lambda i, j: (i, 0)),   # x rows
                pl.BlockSpec((E, K), lambda i, j: (0, 0)),    # w1 resident
                pl.BlockSpec((1, E), lambda i, j: (0, 0)),    # b1 resident
                pl.BlockSpec((TN, E), lambda i, j: (j, 0)),   # stream w2
                pl.BlockSpec((1, TN), lambda i, j: (0, j)),   # stream b2
            ],
            out_specs=pl.BlockSpec((TM, TN), lambda i, j: (i, j)),
            scratch_shapes=[pltpu.VMEM((TM, E), compute_dtype)],  # reused GELU(h)
        ),
        compiler_params=pltpu.CompilerParams(
            dimension_semantics=("parallel", "arbitrary"),
            vmem_limit_bytes=48 << 20),
        cost_estimate=cost,
    )(x2d, w1c, b1_2d, w2c, b2_2d)

    return out.reshape(B, S, V)


def _reference(x, w1, b1, w2, b2):
    h = jnp.einsum("bsk,ek->bse", x, w1) + b1
    h = _gelu_exact(h)
    return jnp.einsum("bse,ve->bsv", h, w2) + b2


if __name__ == "__main__":
    # Small, module-consistent shapes (exercise V tiling: 2 output-column tiles).
    B, S = 2, 8
    n_embed = 32
    image_token_embed = 64
    image_token_size = 256

    key = jax.random.PRNGKey(0)
    kx, kw1, kb1, kw2, kb2 = jax.random.split(key, 5)

    x = jax.random.normal(kx, (B, S, n_embed), dtype=jnp.float32)
    w1 = jax.random.normal(kw1, (image_token_embed, n_embed), jnp.float32) * 0.05
    b1 = jax.random.normal(kb1, (image_token_embed,), jnp.float32) * 0.01
    w2 = jax.random.normal(kw2, (image_token_size, image_token_embed), jnp.float32) * 0.05
    b2 = jax.random.normal(kb2, (image_token_size,), jnp.float32) * 0.01

    # tn_target=128 forces a 2-wide V grid at these toy sizes so the
    # h-scratch reuse path (j > 0) is exercised.
    y = vision_head_forward(x, w1, b1, w2, b2, tn_target=128)
    jax.block_until_ready(y)

    y_ref = _reference(x, w1, b1, w2, b2)
    assert y.shape == (B, S, image_token_size)
    # bf16 matmuls with f32 accumulation vs fp32 reference -> loose tolerance.
    assert jnp.allclose(y, y_ref, atol=2e-2, rtol=2e-2), "mismatch vs reference"

    print("KERNEL_OK")
</pallas_src>

<mosaic_0001>
module attributes {stable_mosaic.version = 11 : i64} {
  func.func @_vision_head_kernel(%arg0: i32, %arg1: i32, %arg2: memref<16x32xbf16, #tpu.memory_space<vmem>>, %arg3: memref<64x32xbf16, #tpu.memory_space<vmem>>, %arg4: memref<1x64xf32, #tpu.memory_space<vmem>>, %arg5: memref<128x64xbf16, #tpu.memory_space<vmem>>, %arg6: memref<1x128xf32, #tpu.memory_space<vmem>>, %arg7: memref<16x128xf32, #tpu.memory_space<vmem>>, %arg8: memref<16x64xbf16, #tpu.memory_space<vmem>>) attributes {dimension_semantics = [#tpu.dimension_semantics<parallel>, #tpu.dimension_semantics<arbitrary>], iteration_bounds = array<i64: 1, 2>, scalar_prefetch = 0 : i64, scratch_operands = 1 : i64, tpu.core_type = #tpu.core_type<tc>, window_params = [{transform_indices = @transform_0, window_bounds = array<i64: 16, 32>}, {pipeline_mode = #tpu.pipeline_mode<synchronous>, transform_indices = @transform_1, window_bounds = array<i64: 64, 32>}, {pipeline_mode = #tpu.pipeline_mode<synchronous>, transform_indices = @transform_2, window_bounds = array<i64: 1, 64>}, {transform_indices = @transform_3, window_bounds = array<i64: 128, 64>}, {transform_indices = @transform_4, window_bounds = array<i64: 1, 128>}, {transform_indices = @transform_5, window_bounds = array<i64: 16, 128>}]} {
    %c0_i32 = arith.constant 0 : i32
    %0 = arith.cmpi eq, %arg1, %c0_i32 : i32
    %1 = arith.extui %0 : i1 to i32
    %c0_i32_0 = arith.constant 0 : i32
    %2 = arith.cmpi ne, %1, %c0_i32_0 : i32
    scf.if %2 {
      %c0_8 = arith.constant 0 : index
      %c0_9 = arith.constant 0 : index
      %10 = vector.load %arg2[%c0_8, %c0_9] : memref<16x32xbf16, #tpu.memory_space<vmem>>, vector<16x32xbf16>
      %c0_10 = arith.constant 0 : index
      %c0_11 = arith.constant 0 : index
      %11 = vector.load %arg3[%c0_10, %c0_11] : memref<64x32xbf16, #tpu.memory_space<vmem>>, vector<64x32xbf16>
      %cst_12 = arith.constant dense<0.000000e+00> : vector<16x64xf32>
      %12 = tpu.matmul %10, %11, %cst_12 {dimension_numbers = #tpu.dot_dimension_numbers<[1], [1], [0], [0], [0, 0, 1, 0], [], []>} : vector<16x32xbf16>, vector<64x32xbf16>, vector<16x64xf32> -> vector<16x64xf32>
      %c0_13 = arith.constant 0 : index
      %c0_14 = arith.constant 0 : index
      %13 = vector.load %arg4[%c0_13, %c0_14] : memref<1x64xf32, #tpu.memory_space<vmem>>, vector<1x64xf32>
      %14 = vector.broadcast %13 : vector<1x64xf32> to vector<16x64xf32>
      %15 = arith.addf %12, %14 : vector<16x64xf32>
      %cst_15 = arith.constant 5.000000e-01 : f32
      %16 = vector.broadcast %cst_15 : f32 to vector<16x64xf32>
      %17 = arith.mulf %16, %15 : vector<16x64xf32>
      %cst_16 = arith.constant 0.707106769 : f32
      %18 = vector.broadcast %cst_16 : f32 to vector<16x64xf32>
      %19 = arith.mulf %15, %18 : vector<16x64xf32>
      %20 = math.erf %19 : vector<16x64xf32>
      %cst_17 = arith.constant 1.000000e+00 : f32
      %21 = vector.broadcast %cst_17 : f32 to vector<16x64xf32>
      %22 = arith.addf %21, %20 : vector<16x64xf32>
      %23 = arith.mulf %17, %22 : vector<16x64xf32>
      %24 = arith.truncf %23 : vector<16x64xf32> to vector<16x64xbf16>
      %c0_18 = arith.constant 0 : index
      %c0_19 = arith.constant 0 : index
      %25 = vector.load %arg8[%c0_18, %c0_19] : memref<16x64xbf16, #tpu.memory_space<vmem>>, vector<16x64xbf16>
      tpu.vector_store %arg8[%c0_18, %c0_19], %24 {strides = array<i32>} : memref<16x64xbf16, #tpu.memory_space<vmem>>, vector<16x64xbf16>,
    } else {
    }
    %c0 = arith.constant 0 : index
    %c0_1 = arith.constant 0 : index
    %3 = vector.load %arg8[%c0, %c0_1] : memref<16x64xbf16, #tpu.memory_space<vmem>>, vector<16x64xbf16>
    %c0_2 = arith.constant 0 : index
    %c0_3 = arith.constant 0 : index
    %4 = vector.load %arg5[%c0_2, %c0_3] : memref<128x64xbf16, #tpu.memory_space<vmem>>, vector<128x64xbf16>
    %cst = arith.constant dense<0.000000e+00> : vector<16x128xf32>
    %5 = tpu.matmul %3, %4, %cst {dimension_numbers = #tpu.dot_dimension_numbers<[1], [1], [0], [0], [0, 0, 1, 0], [], []>} : vector<16x64xbf16>, vector<128x64xbf16>, vector<16x128xf32> -> vector<16x128xf32>
    %c0_4 = arith.constant 0 : index
    %c0_5 = arith.constant 0 : index
    %6 = vector.load %arg6[%c0_4, %c0_5] : memref<1x128xf32, #tpu.memory_space<vmem>>, vector<1x128xf32>
    %7 = vector.broadcast %6 : vector<1x128xf32> to vector<16x128xf32>
    %8 = arith.addf %5, %7 : vector<16x128xf32>
    %c0_6 = arith.constant 0 : index
    %c0_7 = arith.constant 0 : index
    %9 = vector.load %arg7[%c0_6, %c0_7] : memref<16x128xf32, #tpu.memory_space<vmem>>, vector<16x128xf32>
    tpu.vector_store %arg7[%c0_6, %c0_7], %8 {strides = array<i32>} : memref<16x128xf32, #tpu.memory_space<vmem>>, vector<16x128xf32>,
    return
  }
  func.func @transform_0(%arg0: i32, %arg1: i32) -> (i32, i32) {
    %c0_i32 = arith.constant 0 : i32
    %c0_i32_0 = arith.constant 0 : i32
    return %arg0, %c0_i32 : i32, i32
  }
  func.func @transform_1(%arg0: i32, %arg1: i32) -> (i32, i32) {
    %c0_i32 = arith.constant 0 : i32
    %c0_i32_0 = arith.constant 0 : i32
    %c0_i32_1 = arith.constant 0 : i32
    return %c0_i32, %c0_i32_0 : i32, i32
  }
  func.func @transform_2(%arg0: i32, %arg1: i32) -> (i32, i32) {
    %c0_i32 = arith.constant 0 : i32
    %c0_i32_0 = arith.constant 0 : i32
    %c0_i32_1 = arith.constant 0 : i32
    return %c0_i32, %c0_i32_0 : i32, i32
  }
  func.func @transform_3(%arg0: i32, %arg1: i32) -> (i32, i32) {
    %c0_i32 = arith.constant 0 : i32
    %c0_i32_0 = arith.constant 0 : i32
    return %arg1, %c0_i32 : i32, i32
  }
  func.func @transform_4(%arg0: i32, %arg1: i32) -> (i32, i32) {
    %c0_i32 = arith.constant 0 : i32
    %c0_i32_0 = arith.constant 0 : i32
    return %c0_i32, %arg1 : i32, i32
  }
  func.func @transform_5(%arg0: i32, %arg1: i32) -> (i32, i32) {
    %c0_i32 = arith.constant 0 : i32
    return %arg0, %arg1 : i32, i32
  }
}

</mosaic_0001>

<bundles_post_ra>
// kernel: tpu_custom_call.1
= control target key start
LH: loop header
LB: loop body
LE: loop exit
PB: predicated region body
PF: predicated region fallthrough
CT: control target
= control target key end

     0   :  { %10 = vsyncpa [#allocation4], 0  ;;  %s1093_s0 = inlined_call_operand.vmem [shape: bf16[16,32], index: 0, kind: input, shape index: {}]   ;;  %s1094_s1 = inlined_call_operand.vmem [shape: bf16[64,32], index: 1, kind: input, shape index: {}]   ;;  %s1095_s2 = inlined_call_operand.vmem [shape: f32[1,64], index: 2, kind: input, shape index: {}]   ;;  %s1096_s3 = inlined_call_operand.vmem [shape: bf16[256,64], index: 3, kind: input, shape index: {}]   ;;  %s1097_s4 = inlined_call_operand.vmem [shape: f32[1,256], index: 4, kind: input, shape index: {}]   ;;  %s1098_s5 = inlined_call_operand.hbm [shape: f32[16,256], index: 5, kind: output, shape index: {}]  }
   0x1   :  { %12 = vsyncpa [#allocation4 + $0x1], 0  ;;  %s914_s18 = smov 0   ;;  %s916_s19 = smov 0  }
   0x2   :  { %s918_s20 = smov 0   ;;  %s920_s21 = smov 0  }
   0x3   :  { %s922_s22 = smov 0   ;;  %s924_s23 = smov 0  }
   0x4 LB: > { %s640_s24 = sadd.s32 4294967295, %s874_s23   ;;  %s641_s25 = sadd.s32 4294967294, %s874_s23   ;;  %s874_s23 = sphi %s924_s23, %s18_s23   ;;  %s870_s22 = sphi %s922_s22, %s1105_s22   ;;  %s866_s21 = sphi %s920_s21, %s1104_s21   ;;  %s862_s20 = sphi %s918_s20, %s1103_s20   ;;  %s858_s19 = sphi %s916_s19, %s1102_s19   ;;  %s854_s18 = sphi %s914_s18, %s1101_s18  }
   0x5   : > { %s27_s26 = sadd.s32 1, %s870_s22  ;;  %s159_s27 = sadd.s32 1, %s862_s20 }
   0x6   : > { %p28_p0 = scmp.ge.s32.totalorder %s27_s26, 2  ;;  %p169_p1 = scmp.ne.s32.totalorder %s862_s20, %s858_s19 }
   0x7   : > { %p170_p2 = scmp.eq.s32.totalorder %s640_s24, 1  ;;  %p175_p3 = scmp.ne.s32.totalorder %s858_s19, %s854_s18 }
   0x8   : > { %s1107_s26 = smov (%p28_p0, %s27_s26), 0  ;;  %p176_p5 = scmp.eq.s32.totalorder %s641_s25, 1 }
   0x9   : > { %p954_p4 = por %p170_p2, %p169_p1  ;;  %s155_s29 = ssub.s32 %s870_s22, %s1107_s26 }
   0xa   : > { %p645_p6 = scmp.ge.s32.totalorder %s874_s23, 1  ;;  %p157_p7 = scmp.eq.s32.totalorder %s155_s29, 0 }
   0xb   : > { %p961_p8 = por %p176_p5, %p175_p3  ;;  %p224_p9 = scmp.lt.s32.totalorder %s874_s23, 3 }
   0xc   : > { %s967_s6 = scalar_select %p157_p7, %s862_s20, %s159_s27  }
   0xd   : > { %p225_p10 = pnand %p645_p6, %p224_p9 }
   0xe   : > { %s257_s7 = sand.u32 (!%p225_p10), 1, %s858_s19   ;;  %s647_s8 = sshll.u32 (!%p225_p10), %s866_s21, 4 }
   0xf   : > { %228 = sbr.rel (%p225_p10) target bundleno = 590 (0x24e), region = 40  ;;  %s646_s9 = sshll.u32 (!%p225_p10), %s257_s7, 4 }
  0x10   : > { %p267_p11 = scmp.lt.s32.totalorder (!%p225_p10), %s647_s8, 31  ;;  %p272_p12 = scmp.lt.s32.totalorder (!%p225_p10), %s866_s21, 1 }
  0x11   : > { %s986_s24 = scalar_lea.vmem (!%p225_p10), [#allocation3], %s646_s9  ;;  %p649_p13 = scmp.ne.s32.totalorder (!%p225_p10), %s866_s21, 0 }
  0x16   : > { %s1109_s8 = smov (!%p267_p11, %s647_s8), 31  ;;  %280 = sbr.rel (%p649_p13) target bundleno = 293 (0x125), region = 44 }
  0x17   : > { %s975_s10 = scalar_select %p272_p12, %s866_s21, 1 }
  0x18   : > { %s648_s11 = sshll.u32 %s1109_s8, 2  ;;  %v779_v0 = vld [vmem:[%s1094_s1] sm:$0xff] (!%p649_p13)   ;;  %v876_v1 = vmov (!%p649_p13), 0.0   ;;  %vm323_vm0 = vcmask (!%p649_p13), 261120   ;;  %v780_v3 = vld [vmem:[%s1094_s1 + $0x8] sm:$0xff] (!%p649_p13)   ;;  %vm877_vm1 = vmmov (!%p649_p13), 0  }
  0x19   : > { %s980_s14 = scalar_lea.vmem %s1096_s3, %s648_s11  ;;  %s274_s17 = scalar_lea.vmem %s1097_s4, %s975_s10  ;;  %685 = vmatprep.subr.bf16.mxu0 (!%p649_p13), %v876_v1  ;;  %v328_v2 = vsel (!%p649_p13), %vm323_vm0, %v779_v0, 0  ;;  %693 = vmatprep.mubr.msk.bf16.mxu0 (!%p649_p13), %vm877_vm1, %v876_v1  ;;  %v331_v4 = vsel (!%p649_p13), %vm323_vm0, %v780_v3, 0  ;;  %v781_v5 = vld [vmem:[%s1094_s1 + $0x10] sm:$0xff] (!%p649_p13)   ;;  %v782_v7 = vld [vmem:[%s1094_s1 + $0x18] sm:$0xff] (!%p649_p13)   ;;  %v783_v9 = vld [vmem:[%s1093_s0] sm:$0xff] (!%p649_p13)   ;;  %vm391_vm2 = vcmask (!%p649_p13), 523264  }
  0x1a   : > { %686 = vmatpush3.bf16.xpose.msra.mxu0 (!%p649_p13), %v328_v2  ;;  %v334_v6 = vsel (!%p649_p13), %vm323_vm0, %v781_v5, 0  ;;  %v337_v8 = vsel (!%p649_p13), %vm323_vm0, %v782_v7, 0  ;;  %v650_v10 = vld [vmem:[%s1095_s2] ss:$0 sm:$0xff] (!%p649_p13) }
  0x1b   : > { %687 = vmatprep.subr.bf16.mxu0 (!%p649_p13), %v876_v1 }
  0x22   : > { %688 = vmatpush3.bf16.xpose.msra.mxu0 %v331_v4 }
  0x23   : > { %689 = vmatprep.subr.bf16.mxu0 %v876_v1 }
  0x2a   : > { %690 = vmatpush3.bf16.xpose.msra.mxu0 %v334_v6 }
  0x2b   : > { %691 = vmatprep.subr.bf16.mxu0 %v876_v1 }
  0x32   : > { %692 = vmatpush3.bf16.xpose.msra.mxu0 %v337_v8 }
  0x39   : > { %694 = vmatmul.mubr.msk.bf16.vlgmr.msra.gmra.mrb[0].mxu0 %vm323_vm0, %v783_v9 }
 0x10c   : > { %v373_v11 = vpop.f32.mrb[0].mxu0 }
 0x10d   : > { %v374_v12 = vadd.f32 %v650_v10, %v373_v11  ;;  %v695_v13 = vpop.f32.mrb[1].mxu0 }
 0x10e   : > { %v376_v14 = vpop.f32.mrb[2].mxu0 }
 0x10f   : > { %v382_v15 = vmul.f32 0.70710677, %v374_v12  ;;  %v377_v16 = vadd.f32 %v650_v10, %v376_v14  ;;  %v696_v17 = vpop.f32.mrb[3].mxu0  ;;  %v380_v22 = vmul.f32 0.5, %v374_v12 }
 0x111   : > { %784 = verf.f32 %v382_v15  ;;  %v383_v18 = vmul.f32 0.70710677, %v377_v16  ;;  %v381_v23 = vmul.f32 0.5, %v377_v16 }
 0x113   : > { %786 = verf.f32 %v383_v18 }
 0x11b   : > { %v785_v19 = vpop.eup %784 }
 0x11c   : > { %v386_v20 = vadd.f32 1.0, %v785_v19 }
 0x11d   : > { %v787_v21 = vpop.eup %786 }
 0x11e   : > { %v387_v24 = vadd.f32 1.0, %v787_v21  ;;  %v388_v25 = vmul.f32 %v386_v20, %v380_v22 }
 0x120   : > { %v389_v26 = vmul.f32 %v387_v24, %v381_v23 }
 0x122   : > { %v390_v27 = vpack.c.bf16 %v389_v26, %v388_v25 }
 0x124   : > { %392 = vst.msk [vmem:[#allocation2] sm:$0xff] %vm391_vm2, %v390_v27 }
 0x125 PF: > { %v788_v28 = vld [vmem:[%s980_s14] sm:$0xff]   ;;  %v878_v29 = vmov 0.0   ;;  %vm457_vm3 = vcmask 523264   ;;  %v789_v31 = vld [vmem:[%s980_s14 + $0x8] sm:$0xff]   ;;  %vm879_vm4 = vmmov 0   ;;  %v790_v33 = vld [vmem:[%s980_s14 + $0x10] sm:$0xff]  }
 0x126   : > { %697 = vmatprep.subr.bf16.mxu0 %v878_v29  ;;  %v462_v30 = vsel %vm457_vm3, %v788_v28, 0  ;;  %v465_v32 = vsel %vm457_vm3, %v789_v31, 0  ;;  %713 = vmatprep.mubr.msk.bf16.mxu0 %vm879_vm4, %v878_v29  ;;  %v468_v34 = vsel %vm457_vm3, %v790_v33, 0  ;;  %v791_v35 = vld [vmem:[%s980_s14 + $0x18] sm:$0xff]   ;;  %v792_v37 = vld [vmem:[%s980_s14 + $0x20] sm:$0xff]   ;;  %v793_v39 = vld [vmem:[%s980_s14 + $0x28] sm:$0xff]  }
 0x127   : > { %698 = vmatpush3.bf16.xpose.msra.mxu0 %v462_v30  ;;  %v471_v36 = vsel %vm457_vm3, %v791_v35, 0  ;;  %v474_v38 = vsel %vm457_vm3, %v792_v37, 0  ;;  %v477_v40 = vsel %vm457_vm3, %v793_v39, 0  ;;  %v794_v41 = vld [vmem:[%s980_s14 + $0x30] sm:$0xff]   ;;  %v795_v43 = vld [vmem:[%s980_s14 + $0x38] sm:$0xff]   ;;  %s668_s9 = sshll.u32 %s866_s21, 7 }
 0x128   : > { %699 = vmatprep.subr.bf16.mxu0 %v878_v29  ;;  %v480_v42 = vsel %vm457_vm3, %v794_v41, 0  ;;  %v483_v44 = vsel %vm457_vm3, %v795_v43, 0  ;;  %v657_v46 = vld [vmem:[%s274_s17] ss:$0 sm:$0xff]  ;;  %s544_s11 = sshll.u32 %s986_s24, 4  ;;  %s1039_s13 = scalar_lea.hbm %s1098_s5, %s668_s9  ;;  %s1041_s11 = int_to_ptr.vmem [resolvable:$true] %s544_s11 }
 0x129   : > { %s1047_s21 = scalar_lea.sflag [#allocation4], %s257_s7  ;;  %s796_s10 = scalar_lea.vmem %s1041_s11, 256 }
 0x12a   : > { %p797_p0 = scmp.ne.s32.totalorder %s1041_s11, %s796_s10  ;;  %s880_s17 = smov [#allocation3]  }
 0x12b   : > { %v393_v45 = vld [vmem:[#allocation2] sm:$0xff]  ;;  %s800_s15 = sshll.u32 %s880_s17, 4  ;;  %s801_s15 = int_to_ptr.vmem [resolvable:$false] %s800_s15 }
 0x12c   : > { %p798_p1 = pnand %p797_p0, %p954_p4  ;;  %s802_s16 = scalar_lea.vmem %s801_s15, 512 }
 0x12d   : > { %p803_p3 = scmp.lt.s32.totalorder %s1041_s11, %s801_s15  ;;  %p804_p5 = scmp.lt.s32.totalorder %s802_s16, %s796_s10 }
 0x12e   : > { %p799_p2 = pneg %p798_p1 }
 0x12f   : > { %700 = vmatpush3.bf16.xpose.msra.mxu0 %v465_v32  ;;  %p805_p6 = por %p804_p5, %p803_p3 }
 0x130   : > { %701 = vmatprep.subr.bf16.mxu0 %v878_v29 }
 0x131   : > { %p806_p7 = pnand %p805_p6, %p799_p2 }
 0x137   : > { %702 = vmatpush3.bf16.xpose.msra.mxu0 %v468_v34 }
 0x138   : > { %703 = vmatprep.subr.bf16.mxu0 %v878_v29 }
 0x13f   : > { %704 = vmatpush3.bf16.xpose.msra.mxu0 %v471_v36 }
 0x140   : > { %705 = vmatprep.subr.bf16.mxu0 %v878_v29 }
 0x147   : > { %706 = vmatpush3.bf16.xpose.msra.mxu0 %v474_v38 }
 0x148   : > { %707 = vmatprep.subr.bf16.mxu0 %v878_v29 }
 0x14f   : > { %708 = vmatpush3.bf16.xpose.msra.mxu0 %v477_v40 }
 0x150   : > { %709 = vmatprep.subr.bf16.mxu0 %v878_v29 }
 0x157   : > { %710 = vmatpush3.bf16.xpose.msra.mxu0 %v480_v42 }
 0x158   : > { %711 = vmatprep.subr.bf16.mxu0 %v878_v29 }
 0x15f   : > { %712 = vmatpush3.bf16.xpose.msra.mxu0 %v483_v44 }
 0x166   : > { %714 = vmatmul.mubr.msk.bf16.vlgmr.msra.gmra.mrb[0].mxu0 %vm457_vm3, %v393_v45 }
 0x239   : > { %v519_v47 = vpop.f32.mrb[0].mxu0 }
 0x23a   : > { %v520_v48 = vadd.f32 %v657_v46, %v519_v47  ;;  %v715_v49 = vpop.f32.mrb[1].mxu0 }
 0x23b   : > { %v522_v50 = vpop.f32.mrb[2].mxu0 }
 0x23c   : > { %526 = vst [vmem:[%s986_s24] sm:$0xff] %v520_v48  ;;  %v523_v51 = vadd.f32 %v657_v46, %v522_v50  ;;  %v716_v52 = vpop.f32.mrb[3].mxu0 }
 0x23e   : > { %527 = vst [vmem:[%s986_s24 + $0x8] sm:$0xff] %v523_v51 }
 0x23f   : > { %809 = shalt.err (!%p806_p7)
}
 0x240   : > { %s810_s7 = scalar_lea.hbm %s1039_s13, 256  ;;  %s814_s27 = scalar_lea.hbm %s1098_s5, 512 }
 0x241   : > { %p811_p9 = scmp.ne.s32.totalorder %s1039_s13, %s810_s7  ;;  %p815_p12 = scmp.lt.u32.totalorder %s1039_s13, %s1098_s5 }
 0x242   : > { %p816_p13 = scmp.lt.u32.totalorder %s814_s27, %s810_s7  ;;  %p818_p1 = scmp.lt.u32.totalorder %s810_s7, %s1039_s13 }
 0x243   : > { %p812_p10 = pnand %p811_p9, %p954_p4 }
 0x244   : > { %p817_p0 = por %p816_p13, %p815_p12 }
 0x245   : > { %p813_p11 = pneg %p812_p10 }
 0x246   : > { %p819_p2 = por %p818_p1, %p817_p0 }
 0x248   : > { %p820_p3 = pnand %p819_p2, %p813_p11 }
 0x24a   : > { %823 = shalt.err (!%p820_p3)
}
 0x24b   : > { %s881_s9 = smov 128   ;;  %s882_s14 = smov 256  }
 0x24c   : > { %s883_s12 = smov 8  }
 0x24d   : > { %717 = dma.vmem_to_hbm [thread:$0]  (%p954_p4), %s1041_s11, 256, %s1039_s13, %s1047_s21, %s881_s9, %s882_s14, %s883_s12  }
 0x24e PF: > { %p723_p5 = scmp.ge.s32.totalorder %s874_s23, 2  ;;  %s559_s10 = sand.u32 1, %s854_s18  }
 0x24f   : > { %s560_s17 = scalar_lea.sflag [#allocation4], %s559_s10 }
 0x250   : > { %p720_p6 = pnand %p723_p5, %p961_p8 }
 0x252   : > { %849 = dma.done.wait (!%p720_p6), %s560_s17, 256  }
 0x253   : > { %851 = vsyncadd (!%p720_p6), %s560_s17, 4294967040  ;;  %s18_s23 = sadd.s32 1, %s874_s23   ;;  %s1101_s18 = smov %s858_s19 }
 0x254   : > { %p15_p7 = scmp.ge.s32.totalorder %s18_s23, 4   ;;  %s1102_s19 = smov %s862_s20 }
 0x255   : > { %s1103_s20 = smov %s967_s6  ;;  %s1104_s21 = smov %s870_s22 }
 0x256   : > { %s1105_s22 = smov %s1107_s26  ;;  %17 = sbr.rel (!%p15_p7) target bundleno = 4 (0x4), region = 85 }
 0x25d   :  { %565 = vsyncpa [#allocation4], 1 }
 0x25e   :  { %567 = vsyncpa [#allocation4 + $0x1], 1 }

</bundles_post_ra>
